<compile_context>
chip_gen: v6e
topology: v6e:2x2x1
jax: 0.10.0
libtpu: 0.0.40
codegen_flags: <defaults>
</compile_context>

<pallas_src>
import jax
import jax.numpy as jnp
from jax.experimental import pallas as pl
from jax.experimental.pallas import tpu as pltpu

LANE = 128          # TPU lane width; class axis is padded to a multiple of this
NEG_INF = -1e30     # bias value for padded (fake) classes -> exp() == 0


def _round_up(n, m):
    return (n + m - 1) // m * m


# ---------------------------------------------------------------------------
# Kernel: one (TILE_M, H) row-tile of x against the full (H, C_pad) weight.
# ---------------------------------------------------------------------------
def fc_softmax_kernel(x_ref, w_ref, b_ref, o_ref):
    # logits = x @ W_t + b   (W_t already stored as [hidden, C_pad])
    logits = jnp.dot(x_ref[...], w_ref[...], preferred_element_type=jnp.float32)
    logits = logits + b_ref[...]                       # (TILE_M, C_pad)
    # Numerically stable softmax over the class (last / lane) axis.
    # Padded classes carry bias = -1e30, so they never win the max and exp -> 0.
    m = jnp.max(logits, axis=-1, keepdims=True)
    e = jnp.exp(logits - m)
    s = jnp.sum(e, axis=-1, keepdims=True)
    inv = pl.reciprocal(s, approx=True)                # EUP slot
    inv = inv * (2.0 - s * inv)                        # one Newton step -> f32 accuracy
    o_ref[...] = (e * inv).astype(o_ref.dtype)


# ---------------------------------------------------------------------------
# Batched fc + softmax over rows of x2d [M, H]; returns [M, C_pad].
# ---------------------------------------------------------------------------
def fc_softmax_pallas(x2d, w_t, b_pad, tile_m=8):
    M, H = x2d.shape
    Hw, C_pad = w_t.shape
    assert Hw == H and C_pad % LANE == 0

    # Pad M up to a multiple of the row tile so out blocks are (8k, 128)-aligned.
    M_pad = _round_up(max(M, tile_m), tile_m)
    if M_pad != M:
        x2d = jnp.zeros((M_pad, H), x2d.dtype).at[:M, :].set(x2d)

    grid = (M_pad // tile_m,)
    out = pl.pallas_call(
        fc_softmax_kernel,
        out_shape=jax.ShapeDtypeStruct((M_pad, C_pad), jnp.float32),
        grid_spec=pl.GridSpec(
            grid=grid,
            in_specs=[
                pl.BlockSpec((tile_m, H), lambda i: (i, 0)),     # x row tile
                pl.BlockSpec((Hw, C_pad), lambda i: (0, 0)),     # full weight
                pl.BlockSpec((1, C_pad), lambda i: (0, 0)),      # full bias
            ],
            out_specs=pl.BlockSpec((tile_m, C_pad), lambda i: (i, 0)),
        ),
        compiler_params=pltpu.CompilerParams(
            dimension_semantics=("parallel",)),                  # shard batch across TCs
    )(x2d, w_t, b_pad)
    return out[:M]


# ---------------------------------------------------------------------------
# One-time parameter preparation (hoisted out of the per-forward hot path).
# weight: torch layout [num_classes, hidden]; bias: [num_classes]
# ---------------------------------------------------------------------------
def prepare_params(weight, bias):
    C, H = weight.shape
    C_pad = _round_up(C, LANE)
    w_t = jnp.zeros((H, C_pad), jnp.float32).at[:, :C].set(
        jnp.transpose(weight).astype(jnp.float32))
    b_pad = jnp.full((1, C_pad), NEG_INF, jnp.float32).at[0, :C].set(
        bias.astype(jnp.float32))
    return w_t, b_pad, C


# ---------------------------------------------------------------------------
# Torch-equivalent forward (single-sample path of LinearClassification).
# ---------------------------------------------------------------------------
def linear_classification_forward(x, w_t, b_pad, num_classes):
    # torch .squeeze(): drop every size-1 dimension
    squeezed_shape = tuple(d for d in x.shape if d != 1)
    x = x.reshape(squeezed_shape)
    # torch .unsqueeze(0)
    x = x[None, ...]
    # Single-sample path: squeezed x is 1-D -> [1, hidden]; Softmax(dim=1) is the
    # class axis.
    assert x.ndim == 2 and x.shape[0] == 1, (
        "this forward implements the single-sample path of the torch module")
    # TODO(synk): for a squeezed ndim>1 input, torch's Softmax(dim=1) would act on a
    # different axis; that degenerate path is intentionally not reproduced here.
    out = fc_softmax_pallas(x.astype(jnp.float32), w_t, b_pad)
    return out[:, :num_classes]


if __name__ == "__main__":
    hidden = 32
    num_classes = 10

    key = jax.random.PRNGKey(0)
    kx, kw, kb, kbatch = jax.random.split(key, 4)

    # torch.nn.Linear default init: U(-1/sqrt(in_features), 1/sqrt(in_features))
    bound = 1.0 / (hidden ** 0.5)
    weight = jax.random.uniform(kw, (num_classes, hidden), jnp.float32,
                                minval=-bound, maxval=bound)
    bias = jax.random.uniform(kb, (num_classes,), jnp.float32,
                              minval=-bound, maxval=bound)

    # One-time parameter prep (transpose + class-axis padding + cast).
    w_t, b_pad, C = prepare_params(weight, bias)

    # --- single-sample forward, exactly the torch module semantics ---
    x = jax.random.normal(kx, (1, hidden), jnp.float32)
    out = linear_classification_forward(x, w_t, b_pad, num_classes)
    out = jax.block_until_ready(out)

    ref = jax.nn.softmax(x.reshape(1, hidden) @ weight.T + bias, axis=1)
    assert out.shape == (1, num_classes)
    assert jnp.allclose(out, ref, atol=1e-5, rtol=1e-5)
    assert jnp.allclose(jnp.sum(out, axis=1), 1.0, atol=1e-5)

    # --- batched throughput path (same per-row math, gridded over M) ---
    xb = jax.random.normal(kbatch, (16, hidden), jnp.float32)
    outb = jax.block_until_ready(fc_softmax_pallas(xb, w_t, b_pad)[:, :num_classes])
    refb = jax.nn.softmax(xb @ weight.T + bias, axis=1)
    assert outb.shape == (16, num_classes)
    assert jnp.allclose(outb, refb, atol=1e-5, rtol=1e-5)

    print("KERNEL_OK")
</pallas_src>

<mosaic_0001>
module attributes {stable_mosaic.version = 11 : i64} {
  func.func @fc_softmax_kernel(%arg0: i32, %arg1: memref<8x32xf32, #tpu.memory_space<vmem>>, %arg2: memref<32x128xf32, #tpu.memory_space<vmem>>, %arg3: memref<1x128xf32, #tpu.memory_space<vmem>>, %arg4: memref<8x128xf32, #tpu.memory_space<vmem>>) attributes {dimension_semantics = [#tpu.dimension_semantics<parallel>], iteration_bounds = array<i64: 1>, scalar_prefetch = 0 : i64, scratch_operands = 0 : i64, tpu.core_type = #tpu.core_type<tc>, window_params = [{transform_indices = @transform_0, window_bounds = array<i64: 8, 32>}, {pipeline_mode = #tpu.pipeline_mode<synchronous>, transform_indices = @transform_1, window_bounds = array<i64: 32, 128>}, {pipeline_mode = #tpu.pipeline_mode<synchronous>, transform_indices = @transform_2, window_bounds = array<i64: 1, 128>}, {transform_indices = @transform_3, window_bounds = array<i64: 8, 128>}]} {
    %c0 = arith.constant 0 : index
    %c0_0 = arith.constant 0 : index
    %0 = vector.load %arg1[%c0, %c0_0] : memref<8x32xf32, #tpu.memory_space<vmem>>, vector<8x32xf32>
    %c0_1 = arith.constant 0 : index
    %c0_2 = arith.constant 0 : index
    %1 = vector.load %arg2[%c0_1, %c0_2] : memref<32x128xf32, #tpu.memory_space<vmem>>, vector<32x128xf32>
    %cst = arith.constant dense<0.000000e+00> : vector<8x128xf32>
    %2 = tpu.matmul %0, %1, %cst {dimension_numbers = #tpu.dot_dimension_numbers<[1], [0], [0], [1], [0, 0, 1, 1], [], []>} : vector<8x32xf32>, vector<32x128xf32>, vector<8x128xf32> -> vector<8x128xf32>
    %c0_3 = arith.constant 0 : index
    %c0_4 = arith.constant 0 : index
    %3 = vector.load %arg3[%c0_3, %c0_4] : memref<1x128xf32, #tpu.memory_space<vmem>>, vector<1x128xf32>
    %4 = vector.broadcast %3 : vector<1x128xf32> to vector<8x128xf32>
    %5 = arith.addf %2, %4 : vector<8x128xf32>
    %cst_5 = arith.constant dense<0xFF800000> : vector<8xf32>
    %6 = vector.multi_reduction <maximumf>, %5, %cst_5 [1] : vector<8x128xf32> to vector<8xf32>
    %7 = vector.shape_cast %6 : vector<8xf32> to vector<8x1xf32>
    %8 = vector.broadcast %7 : vector<8x1xf32> to vector<8x128xf32>
    %9 = arith.subf %5, %8 : vector<8x128xf32>
    %10 = math.exp %9 : vector<8x128xf32>
    %cst_6 = arith.constant dense<0.000000e+00> : vector<8xf32>
    %11 = vector.multi_reduction <add>, %10, %cst_6 [1] : vector<8x128xf32> to vector<8xf32>
    %12 = vector.shape_cast %11 : vector<8xf32> to vector<8x1xf32>
    %13 = tpu.reciprocal %12 {approx = true} : vector<8x1xf32> -> vector<8x1xf32>
    %14 = arith.mulf %12, %13 : vector<8x1xf32>
    %cst_7 = arith.constant 2.000000e+00 : f32
    %15 = vector.broadcast %cst_7 : f32 to vector<8x1xf32>
    %16 = arith.subf %15, %14 : vector<8x1xf32>
    %17 = arith.mulf %13, %16 : vector<8x1xf32>
    %18 = vector.broadcast %17 : vector<8x1xf32> to vector<8x128xf32>
    %19 = arith.mulf %10, %18 : vector<8x128xf32>
    %c0_8 = arith.constant 0 : index
    %c0_9 = arith.constant 0 : index
    %20 = vector.load %arg4[%c0_8, %c0_9] : memref<8x128xf32, #tpu.memory_space<vmem>>, vector<8x128xf32>
    tpu.vector_store %arg4[%c0_8, %c0_9], %19 {strides = array<i32>} : memref<8x128xf32, #tpu.memory_space<vmem>>, vector<8x128xf32>,
    return
  }
  func.func @transform_0(%arg0: i32) -> (i32, i32) {
    %c0_i32 = arith.constant 0 : i32
    %c0_i32_0 = arith.constant 0 : i32
    return %arg0, %c0_i32 : i32, i32
  }
  func.func @transform_1(%arg0: i32) -> (i32, i32) {
    %c0_i32 = arith.constant 0 : i32
    %c0_i32_0 = arith.constant 0 : i32
    %c0_i32_1 = arith.constant 0 : i32
    return %c0_i32, %c0_i32_0 : i32, i32
  }
  func.func @transform_2(%arg0: i32) -> (i32, i32) {
    %c0_i32 = arith.constant 0 : i32
    %c0_i32_0 = arith.constant 0 : i32
    %c0_i32_1 = arith.constant 0 : i32
    return %c0_i32, %c0_i32_0 : i32, i32
  }
  func.func @transform_3(%arg0: i32) -> (i32, i32) {
    %c0_i32 = arith.constant 0 : i32
    %c0_i32_0 = arith.constant 0 : i32
    return %arg0, %c0_i32 : i32, i32
  }
}

</mosaic_0001>

<bundles_post_ra>
// kernel: tpu_custom_call.1
= control target key start
LH: loop header
LB: loop body
LE: loop exit
PB: predicated region body
PF: predicated region fallthrough
CT: control target
= control target key end

     0   :  { %8 = vsyncpa [#allocation3], 0  ;;  %s290_s0 = inlined_call_operand.hbm [shape: f32[8,32], index: 0, kind: input, shape index: {}]   ;;  %s291_s1 = inlined_call_operand.hbm [shape: f32[32,128], index: 1, kind: input, shape index: {}]   ;;  %s292_s2 = inlined_call_operand.vmem [shape: f32[1,128], index: 2, kind: input, shape index: {}]   ;;  %s293_s3 = inlined_call_operand.hbm [shape: f32[8,128], index: 3, kind: output, shape index: {}]  }
   0x1   :  { %9 = vsyncpa [#allocation6], 0 }
   0x2   :  { %10 = vsyncpa [#allocation4], 0  ;;  %s251_s12 = smov [#allocation2]   ;;  %s252_s14 = smov [#allocation5]  }
   0x3   :  { %s17_s13 = sshll.u32 %s251_s12, 4  ;;  %s26_s15 = sshll.u32 %s252_s14, 4  ;;  %s18_s13 = int_to_ptr.vmem [resolvable:$true] %s17_s13  ;;  %s27_s15 = int_to_ptr.vmem [resolvable:$true] %s26_s15 }
   0x4   :  { %s193_s16 = scalar_lea.vmem %s18_s13, 128  ;;  %p198_p1 = scmp.lt.s32.totalorder %s18_s13, %s18_s13 }
   0x5   :  { %p194_p0 = scmp.ne.s32.totalorder %s18_s13, %s193_s16  ;;  %p199_p2 = scmp.lt.s32.totalorder %s193_s16, %s193_s16 }
   0x7   :  { %p200_p3 = por %p199_p2, %p198_p1 }
   0x9   :  { %p201_p4 = pnand %p200_p3, %p194_p0 }
   0xb   :  { %204 = shalt.err (!%p201_p4)
}
   0xc   :  { %20 = dma.hbm_to_vmem [thread:$0]  %s290_s0, 128, %s18_s13, [#allocation3]  }
   0xd   :  { %s213_s19 = scalar_lea.vmem %s27_s15, 512  ;;  %p218_p6 = scmp.lt.s32.totalorder %s27_s15, %s27_s15 }
   0xe   :  { %p214_p5 = scmp.ne.s32.totalorder %s27_s15, %s213_s19  ;;  %p219_p7 = scmp.lt.s32.totalorder %s213_s19, %s213_s19 }
  0x10   :  { %p220_p8 = por %p219_p7, %p218_p6 }
  0x12   :  { %p221_p9 = pnand %p220_p8, %p214_p5 }
  0x14   :  { %224 = shalt.err (!%p221_p9)
}
  0x15   :  { %s253_s20 = smov 128   ;;  %s254_s21 = smov 8  }
  0x16   :  { %32 = dma.hbm_to_vmem [thread:$0]  %s291_s1, 512, %s27_s15, [#allocation6], %s253_s20, %s253_s20, %s254_s21  }
  0x17   :  { %245 = dma.done.wait [#allocation3], 128  }
  0x18   :  { %246 = vsyncadd [#allocation3], 4294967168 }
  0x19   :  { %247 = dma.done.wait [#allocation6], 512  }
  0x1a   :  { %248 = vsyncadd [#allocation6], 4294966784  ;;  %v255_v0 = vmov 0.0   ;;  %vm256_vm0 = vmmov 0   ;;  %v45_v1 = vld [vmem:[#allocation5 + $0x18] sm:$0xff]  ;;  %v44_v2 = vld [vmem:[#allocation5 + $0x10] sm:$0xff] }
  0x1b   :  { %163 = vmatprep.subr.mxu0 %v255_v0  ;;  %171 = vmatprep.mubr.msk.f32.mxu0 %vm256_vm0, %v255_v0  ;;  %v43_v3 = vld [vmem:[#allocation5 + $0x8] sm:$0xff]  ;;  %v42_v4 = vld [vmem:[#allocation5] sm:$0xff]  ;;  %v41_v5 = vld [vmem:[#allocation2] sm:$0xff]  ;;  %vm53_vm1 = vcmask 261120   ;;  %s257_s24 = smov [#allocation7]  }
  0x1c   :  { %164 = vmatpush3.msra.mxu0 %v45_v1  ;;  %v156_v6 = vld [vmem:[%s292_s2] ss:$0 sm:$0xff]  ;;  %s146_s25 = sshll.u32 %s257_s24, 4  ;;  %s147_s25 = int_to_ptr.vmem [resolvable:$true] %s146_s25 }
  0x1d   :  { %165 = vmatprep.subr.mxu0 %v255_v0  ;;  %s225_s2 = scalar_lea.vmem %s147_s25, 128  ;;  %p230_p11 = scmp.lt.s32.totalorder %s147_s25, %s147_s25 }
  0x1e   :  { %166 = vmatpush3.msra.mxu0 %v44_v2  ;;  %p226_p10 = scmp.ne.s32.totalorder %s147_s25, %s225_s2  ;;  %p231_p12 = scmp.lt.s32.totalorder %s225_s2, %s225_s2 }
  0x1f   :  { %167 = vmatprep.subr.mxu0 %v255_v0 }
  0x20   :  { %168 = vmatpush3.msra.mxu0 %v43_v3  ;;  %p232_p13 = por %p231_p12, %p230_p11 }
  0x21   :  { %169 = vmatprep.subr.mxu0 %v255_v0 }
  0x22   :  { %170 = vmatpush3.msra.mxu0 %v42_v4  ;;  %p233_p0 = pnand %p232_p13, %p226_p10 }
  0x23   :  { %172 = vmatmul.mubr.msk.f32.vlgmr.msra.gmra.mxu0 %vm53_vm1, %v41_v5 }
  0xe3   :  { %v123_v7 = vpop.f32.mrf.mxu0 }
  0xe4   :  { %v124_v8 = vadd.f32 %v156_v6, %v123_v7 }
  0xe5   :  { %v173_v9 = vpop.f32.mrf.mxu0 }
  0xe6   :  { %127 = vmax.xlane.f32.xlu0 %v124_v8 }
 0x16f   :  { %v128_v10 = vpop.xlane.xlu0 %127 }
 0x170   :  { %v129_v11 = vsub.f32 %v124_v8, %v128_v10 }
 0x172   :  { %v130_v12 = vmul.f32 1.442695, %v129_v11 }
 0x174   :  { %181 = vpow2.f32 %v130_v12 }
 0x181   :  { %v182_v13 = vpop.eup %181 }
 0x182   :  { %132 = vadd.xlane.f32.xlu0 %v182_v13 }
 0x20b   :  { %v133_v14 = vpop.xlane.xlu0 %132 }
 0x20c   :  { %183 = vrcp.f32 %v133_v14 }
 0x219   :  { %v184_v15 = vpop.eup %183 }
 0x21a   :  { %v135_v16 = vmul.f32 %v184_v15, %v133_v14 }
 0x21c   :  { %v136_v17 = vsub.f32 2.0, %v135_v16 }
 0x21e   :  { %v137_v18 = vmul.f32 %v184_v15, %v136_v17 }
 0x220   :  { %v138_v19 = vmul.f32 %v182_v13, %v137_v18 }
 0x222   :  { %139 = vst [vmem:[#allocation7] sm:$0xff] %v138_v19 }
 0x223   :  { %236 = shalt.err (!%p233_p0)
}
 0x224   :  { %149 = dma.vmem_to_hbm [thread:$0]  %s147_s25, 128, %s293_s3, [#allocation4]  }
 0x225   :  { %249 = dma.done.wait [#allocation4], 128  }
 0x226   :  { %250 = vsyncadd [#allocation4], 4294967168 }
 0x227   :  { %153 = vsyncpa [#allocation3], 1 }
 0x228   :  { %154 = vsyncpa [#allocation6], 1 }
 0x229   :  { %155 = vsyncpa [#allocation4], 1 }

</bundles_post_ra>
